<compile_context>
chip_gen: v6e
topology: v6e:2x2x1
jax: 0.10.0
libtpu: 0.0.40
codegen_flags: <defaults>
</compile_context>

<pallas_src>
import functools

import jax
import jax.numpy as jnp
from jax import lax
from jax.experimental import pallas as pl
from jax.experimental.pallas import tpu as pltpu

_LANE = 128


def _round_up(n, m):
    return ((n + m - 1) // m) * m


# ----------------------------------------------------------------------------
# Kernels
# ----------------------------------------------------------------------------
def _mlp_trunk(h, layer_refs):
    """Hidden Linear+ReLU stack. layer_refs = [w0, b0, w1, b1, ...] (bf16 w, f32 b)."""
    for i in range(0, len(layer_refs), 2):
        w = layer_refs[i][...]              # (in_pad, out_pad) bf16
        b = layer_refs[i + 1][...]          # (1, out_pad) f32, broadcasts over batch
        y = jnp.dot(h, w, preferred_element_type=jnp.float32) + b
        h = jnp.maximum(y, 0.0).astype(jnp.bfloat16)   # ReLU, back to bf16 for MXU
    return h


def make_discrete_kernel(n_hidden, action_dim):
    """Kernel refs: x, (w,b)*n_hidden, wf, bf, out (all lane-padded)."""

    def kernel(*refs):
        x_ref = refs[0]
        layer_refs = refs[1:1 + 2 * n_hidden]
        wf_ref = refs[1 + 2 * n_hidden]
        bf_ref = refs[2 + 2 * n_hidden]
        out_ref = refs[3 + 2 * n_hidden]

        h = _mlp_trunk(x_ref[...], layer_refs)
        logits = jnp.dot(h, wf_ref[...], preferred_element_type=jnp.float32) + bf_ref[...]
        # Mask padded action lanes so the softmax only covers real actions.
        col = lax.broadcasted_iota(jnp.int32, logits.shape, 1)
        logits = jnp.where(col < action_dim, logits, -1e30)
        # Numerically stable softmax; reciprocal goes to the (idle) EUP slot.
        m = jnp.max(logits, axis=-1, keepdims=True)
        e = jnp.exp(logits - m)
        denom = jnp.sum(e, axis=-1, keepdims=True)
        out_ref[...] = (e * pl.reciprocal(denom, approx=True)).astype(out_ref.dtype)

    return kernel


def make_continuous_kernel(n_hidden, action_max):
    """Kernel refs: x, (w,b)*n_hidden, wm, bm, ws, bs, mean_out, std_out."""

    def kernel(*refs):
        x_ref = refs[0]
        layer_refs = refs[1:1 + 2 * n_hidden]
        wm_ref, bm_ref, ws_ref, bs_ref = refs[1 + 2 * n_hidden: 5 + 2 * n_hidden]
        mean_ref = refs[5 + 2 * n_hidden]
        std_ref = refs[6 + 2 * n_hidden]

        h = _mlp_trunk(x_ref[...], layer_refs)
        # Two independent head matmuls -> no unaligned in-kernel lane slice.
        mean = jnp.dot(h, wm_ref[...], preferred_element_type=jnp.float32) + bm_ref[...]
        std = jnp.dot(h, ws_ref[...], preferred_element_type=jnp.float32) + bs_ref[...]
        mean_ref[...] = (action_max * jnp.tanh(mean)).astype(mean_ref.dtype)
        # softplus(x) = log(1 + exp(x)), stable form.
        std_ref[...] = jnp.logaddexp(std, 0.0).astype(std_ref.dtype)

    return kernel


# ----------------------------------------------------------------------------
# Parameter construction / preparation
# ----------------------------------------------------------------------------
def init_actor_params(key, input_dim, action_dim, actor_dims, is_conti=False):
    """Deterministic synthetic init (PyTorch-like). Weights stored as (in, out), f32."""
    params = []
    dims = [input_dim] + list(actor_dims)
    keys = jax.random.split(key, len(dims))  # one key per linear layer (incl. head)
    for i in range(len(actor_dims)):
        kw, kb = jax.random.split(keys[i])
        scale = 1.0 / jnp.sqrt(dims[i])
        w = jax.random.uniform(kw, (dims[i], dims[i + 1]), jnp.float32, -scale, scale)
        b = jax.random.uniform(kb, (1, dims[i + 1]), jnp.float32, -scale, scale)
        params += [w, b]
    out_dim = 2 * action_dim if is_conti else action_dim
    kw, kb = jax.random.split(keys[-1])
    scale = 1.0 / jnp.sqrt(actor_dims[-1])
    wf = jax.random.uniform(kw, (actor_dims[-1], out_dim), jnp.float32, -scale, scale)
    bf = jax.random.uniform(kb, (1, out_dim), jnp.float32, -scale, scale)
    params += [wf, bf]
    return params


def prepare_actor_params(params, action_dim, is_conti=False):
    """Pad all feature dims to 128-lane multiples (zeros), cast weights to bf16,
    and split the continuous head into separate mean / std weights & biases."""
    n_hidden = (len(params) - 2) // 2
    prepped = []
    for i in range(n_hidden):
        w, b = params[2 * i], params[2 * i + 1]
        ip, op = _round_up(w.shape[0], _LANE), _round_up(w.shape[1], _LANE)
        wp = jnp.zeros((ip, op), jnp.bfloat16).at[:w.shape[0], :w.shape[1]].set(
            w.astype(jnp.bfloat16))
        bp = jnp.zeros((1, op), jnp.float32).at[:, :b.shape[1]].set(b)
        prepped += [wp, bp]

    wf, bf = params[-2], params[-1]
    hp = _round_up(wf.shape[0], _LANE)
    ap = _round_up(action_dim, _LANE)

    def pad_head(w, b):
        wp = jnp.zeros((hp, ap), jnp.bfloat16).at[:w.shape[0], :w.shape[1]].set(
            w.astype(jnp.bfloat16))
        bp = jnp.zeros((1, ap), jnp.float32).at[:, :b.shape[1]].set(b)
        return wp, bp

    if is_conti:
        wm, bm = pad_head(wf[:, :action_dim], bf[:, :action_dim])
        ws, bs = pad_head(wf[:, action_dim:], bf[:, action_dim:])
        prepped += [wm, bm, ws, bs]
    else:
        wfp, bfp = pad_head(wf, bf)
        prepped += [wfp, bfp]
    return prepped


# ----------------------------------------------------------------------------
# Wrapper
# ----------------------------------------------------------------------------
@functools.partial(
    jax.jit, static_argnames=("action_dim", "is_conti", "action_max", "block_batch"))
def actor_forward(x, params, *, action_dim, is_conti=False, action_max=1.0,
                  block_batch=128):
    """x: (batch, input_dim) f32. params: output of prepare_actor_params."""
    batch, in_dim = x.shape
    n_hidden = (len(params) - (4 if is_conti else 2)) // 2
    in_pad = params[0].shape[0]
    a_pad = params[-1].shape[-1]

    bt = min(block_batch, _round_up(batch, 8))
    b_pad = _round_up(batch, bt)
    grid = (b_pad // bt,)

    # Pad batch (sublane) and feature (lane) dims with zeros; cast once to bf16.
    xp = jnp.zeros((b_pad, in_pad), jnp.bfloat16)
    xp = xp.at[:batch, :in_dim].set(x.astype(jnp.bfloat16))

    x_spec = pl.BlockSpec((bt, in_pad), lambda i: (i, 0))
    param_specs = [pl.BlockSpec(p.shape, lambda i: (0, 0)) for p in params]
    in_specs = [x_spec] + param_specs

    # Right-sized VMEM budget: double-buffered blocks + slack, capped for v7x.
    block_bytes = bt * in_pad * 2
    block_bytes += sum(int(p.size) * p.dtype.itemsize for p in params)
    block_bytes += bt * a_pad * 4 * (2 if is_conti else 1)
    vmem_bytes = int(min(2 * block_bytes + (4 << 20), 64 << 20))

    cparams = pltpu.CompilerParams(
        dimension_semantics=("parallel",),   # batch tiles shard across TensorCores
        vmem_limit_bytes=vmem_bytes)

    if is_conti:
        kernel = make_continuous_kernel(n_hidden, float(action_max))
        out_shape = (jax.ShapeDtypeStruct((b_pad, a_pad), jnp.float32),
                     jax.ShapeDtypeStruct((b_pad, a_pad), jnp.float32))
        out_specs = (pl.BlockSpec((bt, a_pad), lambda i: (i, 0)),
                     pl.BlockSpec((bt, a_pad), lambda i: (i, 0)))
        mean_p, std_p = pl.pallas_call(
            kernel, out_shape=out_shape, grid=grid,
            in_specs=in_specs, out_specs=out_specs,
            compiler_params=cparams)(xp, *params)
        return mean_p[:batch, :action_dim], std_p[:batch, :action_dim]

    kernel = make_discrete_kernel(n_hidden, action_dim)
    out_shape = jax.ShapeDtypeStruct((b_pad, a_pad), jnp.float32)
    out_specs = pl.BlockSpec((bt, a_pad), lambda i: (i, 0))
    probs_p = pl.pallas_call(
        kernel, out_shape=out_shape, grid=grid,
        in_specs=in_specs, out_specs=out_specs,
        compiler_params=cparams)(xp, *params)
    return probs_p[:batch, :action_dim]


# ----------------------------------------------------------------------------
# Pure-JAX references
# ----------------------------------------------------------------------------
def actor_forward_ref(x, params, *, action_dim, is_conti=False, action_max=1.0):
    """Reference matching the original f32 PyTorch module."""
    h = x
    n_hidden = (len(params) - 2) // 2
    for i in range(n_hidden):
        h = jnp.maximum(h @ params[2 * i] + params[2 * i + 1], 0.0)
    y = h @ params[-2] + params[-1]
    if is_conti:
        mean, std = y[:, :action_dim], y[:, action_dim:]
        return action_max * jnp.tanh(mean), jax.nn.softplus(std)
    return jax.nn.softmax(y, axis=-1)


def actor_forward_prepped_ref(x, prepped, *, action_dim, is_conti=False, action_max=1.0):
    """Reference matching the kernel's bf16/padded numerics (for tight checks)."""
    batch, in_dim = x.shape
    in_pad = prepped[0].shape[0]
    h = jnp.zeros((batch, in_pad), jnp.bfloat16).at[:, :in_dim].set(
        x.astype(jnp.bfloat16))
    n_hidden = (len(prepped) - (4 if is_conti else 2)) // 2
    for i in range(n_hidden):
        y = jnp.dot(h, prepped[2 * i], preferred_element_type=jnp.float32) + prepped[2 * i + 1]
        h = jnp.maximum(y, 0.0).astype(jnp.bfloat16)
    if is_conti:
        wm, bm, ws, bs = prepped[-4:]
        mean = jnp.dot(h, wm, preferred_element_type=jnp.float32) + bm
        std = jnp.dot(h, ws, preferred_element_type=jnp.float32) + bs
        return ((action_max * jnp.tanh(mean))[:, :action_dim],
                jnp.logaddexp(std, 0.0)[:, :action_dim])
    wf, bf = prepped[-2:]
    logits = jnp.dot(h, wf, preferred_element_type=jnp.float32) + bf
    col = jnp.arange(logits.shape[-1])[None, :]
    logits = jnp.where(col < action_dim, logits, -1e30)
    m = jnp.max(logits, axis=-1, keepdims=True)
    e = jnp.exp(logits - m)
    return (e / jnp.sum(e, axis=-1, keepdims=True))[:, :action_dim]


if __name__ == "__main__":
    # MLP over flat state vectors; batch large enough to fill MXU rows / 2 grid tiles.
    batch = 256
    input_dim = 32
    actor_dims = (64, 64)
    action_dim = 8

    key = jax.random.PRNGKey(0)
    kx, kp1, kp2 = jax.random.split(key, 3)
    x = jax.random.normal(kx, (batch, input_dim), jnp.float32)

    # --- discrete policy head (default is_conti=False) ---
    params_d = init_actor_params(kp1, input_dim, action_dim, actor_dims, is_conti=False)
    prepped_d = prepare_actor_params(params_d, action_dim, is_conti=False)
    probs = actor_forward(x, prepped_d, action_dim=action_dim, is_conti=False)
    probs = jax.block_until_ready(probs)

    probs_bref = actor_forward_prepped_ref(x, prepped_d, action_dim=action_dim,
                                           is_conti=False)
    probs_fref = actor_forward_ref(x, params_d, action_dim=action_dim, is_conti=False)
    assert jnp.allclose(probs, probs_bref, atol=5e-3, rtol=5e-3)   # kernel-exact math
    assert jnp.allclose(probs, probs_fref, atol=1e-1, rtol=1e-1)   # vs f32 module
    assert jnp.allclose(jnp.sum(probs, axis=-1), 1.0, atol=5e-3)

    # --- continuous policy head (is_conti=True) ---
    action_max = 2.0
    params_c = init_actor_params(kp2, input_dim, action_dim, actor_dims, is_conti=True)
    prepped_c = prepare_actor_params(params_c, action_dim, is_conti=True)
    mean, std = actor_forward(x, prepped_c, action_dim=action_dim, is_conti=True,
                              action_max=action_max)
    mean = jax.block_until_ready(mean)
    std = jax.block_until_ready(std)

    mean_bref, std_bref = actor_forward_prepped_ref(
        x, prepped_c, action_dim=action_dim, is_conti=True, action_max=action_max)
    mean_fref, std_fref = actor_forward_ref(
        x, params_c, action_dim=action_dim, is_conti=True, action_max=action_max)
    assert jnp.allclose(mean, mean_bref, atol=5e-3, rtol=5e-3)
    assert jnp.allclose(std, std_bref, atol=5e-3, rtol=5e-3)
    assert jnp.allclose(mean, mean_fref, atol=1e-1, rtol=1e-1)
    assert jnp.allclose(std, std_fref, atol=1e-1, rtol=1e-1)

    print("KERNEL_OK")
</pallas_src>

<mosaic_0001>
module attributes {stable_mosaic.version = 11 : i64} {
  func.func @kernel(%arg0: i32, %arg1: memref<128x128xbf16, #tpu.memory_space<vmem>>, %arg2: memref<128x128xbf16, #tpu.memory_space<vmem>>, %arg3: memref<1x128xf32, #tpu.memory_space<vmem>>, %arg4: memref<128x128xbf16, #tpu.memory_space<vmem>>, %arg5: memref<1x128xf32, #tpu.memory_space<vmem>>, %arg6: memref<128x128xbf16, #tpu.memory_space<vmem>>, %arg7: memref<1x128xf32, #tpu.memory_space<vmem>>, %arg8: memref<128x128xf32, #tpu.memory_space<vmem>>) attributes {dimension_semantics = [#tpu.dimension_semantics<parallel>], iteration_bounds = array<i64: 2>, scalar_prefetch = 0 : i64, scratch_operands = 0 : i64, tpu.core_type = #tpu.core_type<tc>, window_params = [{transform_indices = @transform_0, window_bounds = array<i64: 128, 128>}, {pipeline_mode = #tpu.pipeline_mode<synchronous>, transform_indices = @transform_1, window_bounds = array<i64: 128, 128>}, {pipeline_mode = #tpu.pipeline_mode<synchronous>, transform_indices = @transform_2, window_bounds = array<i64: 1, 128>}, {pipeline_mode = #tpu.pipeline_mode<synchronous>, transform_indices = @transform_3, window_bounds = array<i64: 128, 128>}, {pipeline_mode = #tpu.pipeline_mode<synchronous>, transform_indices = @transform_4, window_bounds = array<i64: 1, 128>}, {pipeline_mode = #tpu.pipeline_mode<synchronous>, transform_indices = @transform_5, window_bounds = array<i64: 128, 128>}, {pipeline_mode = #tpu.pipeline_mode<synchronous>, transform_indices = @transform_6, window_bounds = array<i64: 1, 128>}, {transform_indices = @transform_7, window_bounds = array<i64: 128, 128>}]} {
    %c0 = arith.constant 0 : index
    %c0_0 = arith.constant 0 : index
    %0 = vector.load %arg1[%c0, %c0_0] : memref<128x128xbf16, #tpu.memory_space<vmem>>, vector<128x128xbf16>
    %c0_1 = arith.constant 0 : index
    %c0_2 = arith.constant 0 : index
    %1 = vector.load %arg2[%c0_1, %c0_2] : memref<128x128xbf16, #tpu.memory_space<vmem>>, vector<128x128xbf16>
    %c0_3 = arith.constant 0 : index
    %c0_4 = arith.constant 0 : index
    %2 = vector.load %arg3[%c0_3, %c0_4] : memref<1x128xf32, #tpu.memory_space<vmem>>, vector<1x128xf32>
    %cst = arith.constant dense<0.000000e+00> : vector<128x128xf32>
    %3 = tpu.matmul %0, %1, %cst {dimension_numbers = #tpu.dot_dimension_numbers<[1], [0], [0], [1], [0, 0, 1, 1], [], []>} : vector<128x128xbf16>, vector<128x128xbf16>, vector<128x128xf32> -> vector<128x128xf32>
    %4 = vector.broadcast %2 : vector<1x128xf32> to vector<128x128xf32>
    %5 = arith.addf %3, %4 : vector<128x128xf32>
    %cst_5 = arith.constant 0.000000e+00 : f32
    %6 = vector.broadcast %cst_5 : f32 to vector<128x128xf32>
    %7 = arith.maximumf %5, %6 : vector<128x128xf32>
    %8 = arith.truncf %7 : vector<128x128xf32> to vector<128x128xbf16>
    %c0_6 = arith.constant 0 : index
    %c0_7 = arith.constant 0 : index
    %9 = vector.load %arg4[%c0_6, %c0_7] : memref<128x128xbf16, #tpu.memory_space<vmem>>, vector<128x128xbf16>
    %c0_8 = arith.constant 0 : index
    %c0_9 = arith.constant 0 : index
    %10 = vector.load %arg5[%c0_8, %c0_9] : memref<1x128xf32, #tpu.memory_space<vmem>>, vector<1x128xf32>
    %cst_10 = arith.constant dense<0.000000e+00> : vector<128x128xf32>
    %11 = tpu.matmul %8, %9, %cst_10 {dimension_numbers = #tpu.dot_dimension_numbers<[1], [0], [0], [1], [0, 0, 1, 1], [], []>} : vector<128x128xbf16>, vector<128x128xbf16>, vector<128x128xf32> -> vector<128x128xf32>
    %12 = vector.broadcast %10 : vector<1x128xf32> to vector<128x128xf32>
    %13 = arith.addf %11, %12 : vector<128x128xf32>
    %cst_11 = arith.constant 0.000000e+00 : f32
    %14 = vector.broadcast %cst_11 : f32 to vector<128x128xf32>
    %15 = arith.maximumf %13, %14 : vector<128x128xf32>
    %16 = arith.truncf %15 : vector<128x128xf32> to vector<128x128xbf16>
    %c0_12 = arith.constant 0 : index
    %c0_13 = arith.constant 0 : index
    %17 = vector.load %arg6[%c0_12, %c0_13] : memref<128x128xbf16, #tpu.memory_space<vmem>>, vector<128x128xbf16>
    %cst_14 = arith.constant dense<0.000000e+00> : vector<128x128xf32>
    %18 = tpu.matmul %16, %17, %cst_14 {dimension_numbers = #tpu.dot_dimension_numbers<[1], [0], [0], [1], [0, 0, 1, 1], [], []>} : vector<128x128xbf16>, vector<128x128xbf16>, vector<128x128xf32> -> vector<128x128xf32>
    %c0_15 = arith.constant 0 : index
    %c0_16 = arith.constant 0 : index
    %19 = vector.load %arg7[%c0_15, %c0_16] : memref<1x128xf32, #tpu.memory_space<vmem>>, vector<1x128xf32>
    %20 = vector.broadcast %19 : vector<1x128xf32> to vector<128x128xf32>
    %21 = arith.addf %18, %20 : vector<128x128xf32>
    %22 = tpu.iota {dimensions = array<i32: 1>} : vector<128x128xi32>
    %c8_i32 = arith.constant 8 : i32
    %23 = vector.broadcast %c8_i32 : i32 to vector<128x128xi32>
    %24 = arith.cmpi slt, %22, %23 : vector<128x128xi32>
    %cst_17 = arith.constant -1.000000e+30 : f32
    %25 = vector.broadcast %cst_17 : f32 to vector<128x128xf32>
    %26 = arith.select %24, %21, %25 : vector<128x128xi1>, vector<128x128xf32>
    %cst_18 = arith.constant dense<0xFF800000> : vector<128xf32>
    %27 = vector.multi_reduction <maximumf>, %26, %cst_18 [1] : vector<128x128xf32> to vector<128xf32>
    %28 = vector.shape_cast %27 : vector<128xf32> to vector<128x1xf32>
    %29 = vector.broadcast %28 : vector<128x1xf32> to vector<128x128xf32>
    %30 = arith.subf %26, %29 : vector<128x128xf32>
    %31 = math.exp %30 : vector<128x128xf32>
    %cst_19 = arith.constant dense<0.000000e+00> : vector<128xf32>
    %32 = vector.multi_reduction <add>, %31, %cst_19 [1] : vector<128x128xf32> to vector<128xf32>
    %33 = vector.shape_cast %32 : vector<128xf32> to vector<128x1xf32>
    %34 = tpu.reciprocal %33 {approx = true} : vector<128x1xf32> -> vector<128x1xf32>
    %35 = vector.broadcast %34 : vector<128x1xf32> to vector<128x128xf32>
    %36 = arith.mulf %31, %35 : vector<128x128xf32>
    %c0_20 = arith.constant 0 : index
    %c0_21 = arith.constant 0 : index
    %37 = vector.load %arg8[%c0_20, %c0_21] : memref<128x128xf32, #tpu.memory_space<vmem>>, vector<128x128xf32>
    tpu.vector_store %arg8[%c0_20, %c0_21], %36 {strides = array<i32>} : memref<128x128xf32, #tpu.memory_space<vmem>>, vector<128x128xf32>,
    return
  }
  func.func @transform_0(%arg0: i32) -> (i32, i32) {
    %c0_i32 = arith.constant 0 : i32
    %c0_i32_0 = arith.constant 0 : i32
    return %arg0, %c0_i32 : i32, i32
  }
  func.func @transform_1(%arg0: i32) -> (i32, i32) {
    %c0_i32 = arith.constant 0 : i32
    %c0_i32_0 = arith.constant 0 : i32
    %c0_i32_1 = arith.constant 0 : i32
    return %c0_i32, %c0_i32_0 : i32, i32
  }
  func.func @transform_2(%arg0: i32) -> (i32, i32) {
    %c0_i32 = arith.constant 0 : i32
    %c0_i32_0 = arith.constant 0 : i32
    %c0_i32_1 = arith.constant 0 : i32
    return %c0_i32, %c0_i32_0 : i32, i32
  }
  func.func @transform_3(%arg0: i32) -> (i32, i32) {
    %c0_i32 = arith.constant 0 : i32
    %c0_i32_0 = arith.constant 0 : i32
    %c0_i32_1 = arith.constant 0 : i32
    return %c0_i32, %c0_i32_0 : i32, i32
  }
  func.func @transform_4(%arg0: i32) -> (i32, i32) {
    %c0_i32 = arith.constant 0 : i32
    %c0_i32_0 = arith.constant 0 : i32
    %c0_i32_1 = arith.constant 0 : i32
    return %c0_i32, %c0_i32_0 : i32, i32
  }
  func.func @transform_5(%arg0: i32) -> (i32, i32) {
    %c0_i32 = arith.constant 0 : i32
    %c0_i32_0 = arith.constant 0 : i32
    %c0_i32_1 = arith.constant 0 : i32
    return %c0_i32, %c0_i32_0 : i32, i32
  }
  func.func @transform_6(%arg0: i32) -> (i32, i32) {
    %c0_i32 = arith.constant 0 : i32
    %c0_i32_0 = arith.constant 0 : i32
    %c0_i32_1 = arith.constant 0 : i32
    return %c0_i32, %c0_i32_0 : i32, i32
  }
  func.func @transform_7(%arg0: i32) -> (i32, i32) {
    %c0_i32 = arith.constant 0 : i32
    %c0_i32_0 = arith.constant 0 : i32
    return %arg0, %c0_i32 : i32, i32
  }
}

</mosaic_0001>

<bundles_post_ra>
// kernel: actor_forward.1
= control target key start
LH: loop header
LB: loop body
LE: loop exit
PB: predicated region body
PF: predicated region fallthrough
CT: control target
= control target key end

     0   :  { %s1492_s24 = smov 0   ;;  %s1771_s0 = inlined_call_operand.vmem [shape: bf16[256,128], index: 0, kind: input, shape index: {}]   ;;  %s1772_s1 = inlined_call_operand.vmem [shape: bf16[128,128], index: 1, kind: input, shape index: {}]   ;;  %s1773_s2 = inlined_call_operand.vmem [shape: f32[1,128], index: 2, kind: input, shape index: {}]   ;;  %s1774_s3 = inlined_call_operand.vmem [shape: bf16[128,128], index: 3, kind: input, shape index: {}]   ;;  %s1775_s4 = inlined_call_operand.vmem [shape: f32[1,128], index: 4, kind: input, shape index: {}]   ;;  %s1776_s5 = inlined_call_operand.vmem [shape: bf16[128,128], index: 5, kind: input, shape index: {}]   ;;  %s1777_s6 = inlined_call_operand.vmem [shape: f32[1,128], index: 6, kind: input, shape index: {}]   ;;  %s1778_s7 = inlined_call_operand.vmem [shape: f32[256,128], index: 7, kind: output, shape index: {}]  }
   0x1 LB: > { %s1134_s25 = sadd.s32 4294967295, %s1450_s24   ;;  %p1138_p0 = scmp.ge.s32.totalorder %s1450_s24, 1  ;;  %s1450_s24 = sphi %s1492_s24, %s17_s24  }
   0x2   : > { %p238_p1 = scmp.lt.s32.totalorder %s1450_s24, 3 }
   0x4   : > { %p239_p2 = pnand %p1138_p0, %p238_p1 }
   0x5   : > { %s1139_s28 = sshll.u32 (!%p239_p2), %s1134_s25, 4 }
   0x6   : > { %242 = sbr.rel (%p239_p2) target bundleno = 997 (0x3e5), region = 48  ;;  %p271_p3 = scmp.lt.s32.totalorder (!%p239_p2), %s1139_s28, 31 }
   0xb   : > { %v1348_v0 = vld [vmem:[%s1772_s1 + $0x38] sm:$0xff]   ;;  %v1349_v1 = vld [vmem:[%s1772_s1 + $0x30] sm:$0xff]   ;;  %s1780_s28 = smov (!%p271_p3, %s1139_s28), 31  ;;  %v1350_v2 = vld [vmem:[%s1772_s1 + $0x28] sm:$0xff]  }
   0xc   : > { %1228 = vmatprep.subr.bf16.mxu0 %v1348_v0  ;;  %s1140_s10 = sshll.u32 %s1780_s28, 2  ;;  %v1351_v3 = vld [vmem:[%s1772_s1 + $0x20] sm:$0xff]   ;;  %v1352_v5 = vld [vmem:[%s1772_s1 + $0x18] sm:$0xff]   ;;  %v1353_v6 = vld [vmem:[%s1772_s1 + $0x10] sm:$0xff]   ;;  %s1142_s20 = sshll.u32 %s1780_s28, 3 }
   0xd   : > { %1229 = vmatpush3.bf16.msra.mxu0 %v1348_v0  ;;  %s1515_s13 = scalar_lea.vmem %s1771_s0, %s1140_s10  ;;  %v1364_v7 = vld [vmem:[%s1774_s3 + $0x38] sm:$0xff]   ;;  %v1365_v8 = vld [vmem:[%s1774_s3 + $0x30] sm:$0xff]   ;;  %v1354_v9 = vld [vmem:[%s1772_s1 + $0x8] sm:$0xff]   ;;  %s1734_s23 = scalar_lea.vmem %s1778_s7, %s1142_s20 }
   0xe   : > { %1230 = vmatprep.subr.bf16.mxu0 %v1349_v1  ;;  %v1356_v4 = vld [vmem:[%s1515_s13] sm:$0xff]   ;;  %1260 = vmatprep.subr.bf16.mxu1 %v1364_v7  ;;  %v1366_v10 = vld [vmem:[%s1774_s3 + $0x28] sm:$0xff]   ;;  %v1368_v13 = vld [vmem:[%s1774_s3 + $0x18] sm:$0xff]  }
   0xf   : > { %1244 = vmatprep.mubr.bf16.mxu0 %v1356_v4  ;;  %1261 = vmatpush3.bf16.msra.mxu1 %v1364_v7  ;;  %v1355_v11 = vld [vmem:[%s1772_s1] sm:$0xff]   ;;  %v1357_v14 = vld [vmem:[%s1515_s13 + $0x8] sm:$0xff]   ;;  %v1358_v15 = vld [vmem:[%s1515_s13 + $0x10] sm:$0xff]  }
  0x10   : > { %1262 = vmatprep.subr.bf16.mxu1 %v1365_v8  ;;  %v1367_v12 = vld [vmem:[%s1774_s3 + $0x20] sm:$0xff]   ;;  %v1359_v16 = vld [vmem:[%s1515_s13 + $0x18] sm:$0xff]   ;;  %v1361_v18 = vld [vmem:[%s1515_s13 + $0x28] sm:$0xff]  }
  0x11   : > { %1231 = vmatpush3.bf16.msra.mxu0 %v1349_v1  ;;  %v1360_v17 = vld [vmem:[%s1515_s13 + $0x20] sm:$0xff]   ;;  %v1362_v19 = vld [vmem:[%s1515_s13 + $0x30] sm:$0xff]   ;;  %v1363_v20 = vld [vmem:[%s1515_s13 + $0x38] sm:$0xff]  }
  0x12   : > { %1232 = vmatprep.subr.bf16.mxu0 %v1350_v2  ;;  %v1369_v21 = vld [vmem:[%s1774_s3 + $0x10] sm:$0xff]   ;;  %v1370_v22 = vld [vmem:[%s1774_s3 + $0x8] sm:$0xff]   ;;  %v1371_v23 = vld [vmem:[%s1774_s3] sm:$0xff]  }
  0x13   : > { %1263 = vmatpush3.bf16.msra.mxu1 %v1365_v8  ;;  %v1372_v24 = vld [vmem:[%s1776_s5 + $0x38] sm:$0xff]   ;;  %v1373_v25 = vld [vmem:[%s1776_s5 + $0x30] sm:$0xff]   ;;  %v1374_v26 = vld [vmem:[%s1776_s5 + $0x28] sm:$0xff]  }
  0x14   : > { %1264 = vmatprep.subr.bf16.mxu1 %v1366_v10  ;;  %v1375_v27 = vld [vmem:[%s1776_s5 + $0x20] sm:$0xff]   ;;  %v1579_v28 = vld [vmem:[%s1776_s5 + $0x18] sm:$0xff]  }
  0x15   : > { %1233 = vmatpush3.bf16.msra.mxu0 %v1350_v2  ;;  %v1143_v31 = vld [vmem:[%s1773_s2] ss:$0 sm:$0xff] }
  0x16   : > { %1234 = vmatprep.subr.bf16.mxu0 %v1351_v3 }
  0x17   : > { %1265 = vmatpush3.bf16.msra.mxu1 %v1366_v10 }
  0x18   : > { %1266 = vmatprep.subr.bf16.mxu1 %v1367_v12 }
  0x19   : > { %1235 = vmatpush3.bf16.msra.mxu0 %v1351_v3 }
  0x1a   : > { %1236 = vmatprep.subr.bf16.mxu0 %v1352_v5 }
  0x1b   : > { %1267 = vmatpush3.bf16.msra.mxu1 %v1367_v12 }
  0x1c   : > { %1268 = vmatprep.subr.bf16.mxu1 %v1368_v13 }
  0x1d   : > { %1237 = vmatpush3.bf16.msra.mxu0 %v1352_v5 }
  0x1e   : > { %1238 = vmatprep.subr.bf16.mxu0 %v1353_v6 }
  0x1f   : > { %1269 = vmatpush3.bf16.msra.mxu1 %v1368_v13 }
  0x20   : > { %1270 = vmatprep.subr.bf16.mxu1 %v1369_v21 }
  0x21   : > { %1239 = vmatpush3.bf16.msra.mxu0 %v1353_v6 }
  0x22   : > { %1240 = vmatprep.subr.bf16.mxu0 %v1354_v9 }
  0x23   : > { %1271 = vmatpush3.bf16.msra.mxu1 %v1369_v21 }
  0x24   : > { %1272 = vmatprep.subr.bf16.mxu1 %v1370_v22 }
  0x25   : > { %1241 = vmatpush3.bf16.msra.mxu0 %v1354_v9 }
  0x26   : > { %1242 = vmatprep.subr.bf16.mxu0 %v1355_v11 }
  0x27   : > { %1273 = vmatpush3.bf16.msra.mxu1 %v1370_v22  ;;  %v1377_v22 = vld [vmem:[%s1776_s5 + $0x10] sm:$0xff]  }
  0x28   : > { %1274 = vmatprep.subr.bf16.mxu1 %v1371_v23 }
  0x29   : > { %1243 = vmatpush3.bf16.msra.mxu0 %v1355_v11 }
  0x2a   : > { %1292 = vmatprep.subr.bf16.mxu0 %v1372_v24 }
  0x2b   : > { %1275 = vmatpush3.bf16.msra.mxu1 %v1371_v23  ;;  %v1378_v23 = vld [vmem:[%s1776_s5 + $0x8] sm:$0xff]  }
  0x2c   : > { %1245 = vmatmul.mubr.bf16.vlgmr.msra.gmra.mxu0 %v1357_v14  ;;  %1324 = vmatprep.subr.bf16.mxu1 %v1372_v24 }
  0x2d   : > { %1248 = vmatprep.mubr.bf16.mxu0 %v1358_v15  ;;  %1293 = vmatpush3.bf16.msra.mxu0 %v1372_v24 }
  0x2e   : > { %1294 = vmatprep.subr.bf16.mxu0 %v1373_v25 }
  0x31   : > { %1295 = vmatpush3.bf16.msra.mxu0 %v1373_v25 }
  0x32   : > { %1296 = vmatprep.subr.bf16.mxu0 %v1374_v26 }
  0x34   : > { %1249 = vmatmul.mubr.bf16.gmra.mxu0 %v1359_v16 }
  0x35   : > { %1252 = vmatprep.mubr.bf16.mxu0 %v1360_v17  ;;  %1297 = vmatpush3.bf16.msra.mxu0 %v1374_v26 }
  0x36   : > { %1298 = vmatprep.subr.bf16.mxu0 %v1375_v27 }
  0x39   : > { %1299 = vmatpush3.bf16.msra.mxu0 %v1375_v27 }
  0x3a   : > { %1300 = vmatprep.subr.bf16.mxu0 %v1579_v28 }
  0x3c   : > { %1253 = vmatmul.mubr.bf16.gmra.mxu0 %v1361_v18 }
  0x3d   : > { %1256 = vmatprep.mubr.bf16.mxu0 %v1362_v19  ;;  %1301 = vmatpush3.bf16.msra.mxu0 %v1579_v28 }
  0x3e   : > { %1302 = vmatprep.subr.bf16.mxu0 %v1377_v22 }
  0x41   : > { %1303 = vmatpush3.bf16.msra.mxu0 %v1377_v22 }
  0x42   : > { %1304 = vmatprep.subr.bf16.mxu0 %v1378_v23 }
  0x44   : > { %1257 = vmatmul.mubr.bf16.gmra.mxu0 %v1363_v20 }
  0x45   : > { %1305 = vmatpush3.bf16.msra.mxu0 %v1378_v23 }
  0xec   : > { %v1246_v29 = vpop.f32.mrf.mxu0 }
  0xed   : > { %v461_v35 = vadd.f32 %v1246_v29, %v1143_v31 }
  0xee   : > { %v452_v30 = vpop.f32.mrf.mxu0 }
  0xef   : > { %v453_v33 = vadd.f32 %v1143_v31, %v452_v30  ;;  %v517_v42 = vmax.f32 %v461_v35, 0.0 }
  0xf0   : > { %v1247_v32 = vpop.f32.mrf.mxu0 }
  0xf1   : > { %v464_v34 = vadd.f32 %v1247_v32, %v1143_v31  ;;  %v515_v40 = vmax.f32 %v453_v33, 0.0 }
  0xf2   : > { %v455_v36 = vpop.f32.mrf.mxu0 }
  0xf3   : > { %v456_v37 = vadd.f32 %v1143_v31, %v455_v36  ;;  %v518_v38 = vmax.f32 %v464_v34, 0.0 }
  0xf4   : > { %v1250_v39 = vpop.f32.mrf.mxu0 }
  0xf5   : > { %v516_v41 = vmax.f32 %v456_v37, 0.0  ;;  %v532_v45 = vpack.c.bf16 %v518_v38, %v517_v42  ;;  %v477_v49 = vadd.f32 %v1250_v39, %v1143_v31 }
  0xf6   : > { %v468_v43 = vpop.f32.mrf.mxu0 }
  0xf7   : > { %v531_v44 = vpack.c.bf16 %v516_v41, %v515_v40  ;;  %v469_v47 = vadd.f32 %v1143_v31, %v468_v43  ;;  %v521_v56 = vmax.f32 %v477_v49, 0.0 }
  0xf8   : > { %v1251_v46 = vpop.f32.mrf.mxu0 }
  0xf9   : > { %v480_v48 = vadd.f32 %v1251_v46, %v1143_v31  ;;  %1276 = vmatprep.mubr.bf16.mxu1 %v531_v44  ;;  %v519_v54 = vmax.f32 %v469_v47, 0.0 }
  0xfa   : > { %v471_v50 = vpop.f32.mrf.mxu0  ;;  %1277 = vmatmul.mubr.bf16.vlgmr.msra.gmra.mxu1 %v532_v45 }
  0xfb   : > { %v472_v51 = vadd.f32 %v1143_v31, %v471_v50  ;;  %1332 = vmatpush3.bf16.msra.mxu1 %v1372_v24  ;;  %v522_v52 = vmax.f32 %v480_v48, 0.0  ;;  %v1379_v24 = vld [vmem:[%s1776_s5] sm:$0xff]  }
  0xfc   : > { %v1254_v53 = vpop.f32.mrf.mxu0  ;;  %1325 = vmatprep.subr.bf16.mxu1 %v1373_v25  ;;  %1306 = vmatprep.subr.bf16.mxu0 %v1379_v24 }
  0xfd   : > { %v520_v55 = vmax.f32 %v472_v51, 0.0  ;;  %v534_v59 = vpack.c.bf16 %v522_v52, %v521_v56  ;;  %v493_v63 = vadd.f32 %v1254_v53, %v1143_v31  ;;  %1307 = vmatpush3.bf16.msra.mxu0 %v1379_v24 }
  0xfe   : > { %v484_v57 = vpop.f32.mrf.mxu0 }
  0xff   : > { %v533_v58 = vpack.c.bf16 %v520_v55, %v519_v54  ;;  %1333 = vmatpush3.bf16.msra.mxu1 %v1373_v25  ;;  %v485_v61 = vadd.f32 %v1143_v31, %v484_v57  ;;  %v525_v6 = vmax.f32 %v493_v63, 0.0 }
 0x100   : > { %v1255_v60 = vpop.f32.mrf.mxu0  ;;  %1326 = vmatprep.subr.bf16.mxu1 %v1374_v26 }
 0x101   : > { %v496_v62 = vadd.f32 %v1255_v60, %v1143_v31  ;;  %1280 = vmatprep.mubr.bf16.mxu1 %v533_v58  ;;  %v523_v4 = vmax.f32 %v485_v61, 0.0 }
 0x102   : > { %v487_v0 = vpop.f32.mrf.mxu0  ;;  %1281 = vmatmul.mubr.bf16.gmra.mxu1 %v534_v59 }
 0x103   : > { %v488_v1 = vadd.f32 %v1143_v31, %v487_v0  ;;  %1334 = vmatpush3.bf16.msra.mxu1 %v1374_v26  ;;  %v526_v2 = vmax.f32 %v496_v62, 0.0 }
 0x104   : > { %v1258_v3 = vpop.f32.mrf.mxu0  ;;  %1327 = vmatprep.subr.bf16.mxu1 %v1375_v27 }
 0x105   : > { %v524_v5 = vmax.f32 %v488_v1, 0.0  ;;  %v536_v9 = vpack.c.bf16 %v526_v2, %v525_v6  ;;  %v509_v13 = vadd.f32 %v1258_v3, %v1143_v31 }
 0x106   : > { %v500_v7 = vpop.f32.mrf.mxu0 }
 0x107   : > { %v535_v8 = vpack.c.bf16 %v524_v5, %v523_v4  ;;  %1335 = vmatpush3.bf16.msra.mxu1 %v1375_v27  ;;  %v501_v11 = vadd.f32 %v1143_v31, %v500_v7  ;;  %v529_v19 = vmax.f32 %v509_v13, 0.0  ;;  %v1160_v27 = vld [vmem:[%s1775_s4] ss:$0 sm:$0xff] }
 0x108   : > { %v1259_v10 = vpop.f32.mrf.mxu0  ;;  %1328 = vmatprep.subr.bf16.mxu1 %v1579_v28 }
 0x109   : > { %v512_v12 = vadd.f32 %v1259_v10, %v1143_v31  ;;  %1284 = vmatprep.mubr.bf16.mxu1 %v535_v8  ;;  %v527_v17 = vmax.f32 %v501_v11, 0.0 }
 0x10a   : > { %v503_v14 = vpop.f32.mrf.mxu0  ;;  %1285 = vmatmul.mubr.bf16.gmra.mxu1 %v536_v9 }
 0x10b   : > { %v504_v15 = vadd.f32 %v1143_v31, %v503_v14  ;;  %1336 = vmatpush3.bf16.msra.mxu1 %v1579_v28  ;;  %v530_v16 = vmax.f32 %v512_v12, 0.0 }
 0x10c   : > { %1329 = vmatprep.subr.bf16.mxu1 %v1377_v22 }
 0x10d   : > { %v528_v18 = vmax.f32 %v504_v15, 0.0  ;;  %v538_v21 = vpack.c.bf16 %v530_v16, %v529_v19 }
 0x10f   : > { %v537_v20 = vpack.c.bf16 %v528_v18, %v527_v17  ;;  %1337 = vmatpush3.bf16.msra.mxu1 %v1377_v22  ;;  %v899_v18 = vlaneseq }
 0x110   : > { %1330 = vmatprep.subr.bf16.mxu1 %v1378_v23 }
 0x111   : > { %1288 = vmatprep.mubr.bf16.mxu1 %v537_v20  ;;  %v1600_v19 = vand.u32 127, %v899_v18  ;;  %v1169_v20 = vld [vmem:[%s1777_s6] ss:$0 sm:$0xff] }
 0x112   : > { %1289 = vmatmul.mubr.bf16.gmra.mxu1 %v538_v21 }
 0x113   : > { %1338 = vmatpush3.bf16.msra.mxu1 %v1378_v23  ;;  %vm901_vm0 = vcmp.lt.s32.totalorder %v1600_v19, 8 }
 0x114   : > { %1331 = vmatprep.subr.bf16.mxu1 %v1379_v24 }
 0x117   : > { %1339 = vmatpush3.bf16.msra.mxu1 %v1379_v24 }
 0x1ba   : > { %v1278_v25 = vpop.f32.mrf.mxu1 }
 0x1bb   : > { %v653_v31 = vadd.f32 %v1278_v25, %v1160_v27 }
 0x1bc   : > { %v644_v26 = vpop.f32.mrf.mxu1 }
 0x1bd   : > { %v645_v29 = vadd.f32 %v1160_v27, %v644_v26  ;;  %v709_v38 = vmax.f32 %v653_v31, 0.0 }
 0x1be   : > { %v1279_v28 = vpop.f32.mrf.mxu1 }
 0x1bf   : > { %v656_v30 = vadd.f32 %v1279_v28, %v1160_v27  ;;  %v707_v36 = vmax.f32 %v645_v29, 0.0 }
 0x1c0   : > { %v647_v32 = vpop.f32.mrf.mxu1 }
 0x1c1   : > { %v648_v33 = vadd.f32 %v1160_v27, %v647_v32  ;;  %v710_v34 = vmax.f32 %v656_v30, 0.0 }
 0x1c2   : > { %v1282_v35 = vpop.f32.mrf.mxu1 }
 0x1c3   : > { %v708_v37 = vmax.f32 %v648_v33, 0.0  ;;  %v724_v41 = vpack.c.bf16 %v710_v34, %v709_v38  ;;  %v669_v45 = vadd.f32 %v1282_v35, %v1160_v27 }
 0x1c4   : > { %v660_v39 = vpop.f32.mrf.mxu1 }
 0x1c5   : > { %v723_v40 = vpack.c.bf16 %v708_v37, %v707_v36  ;;  %v661_v43 = vadd.f32 %v1160_v27, %v660_v39  ;;  %v713_v52 = vmax.f32 %v669_v45, 0.0 }
 0x1c6   : > { %v1283_v42 = vpop.f32.mrf.mxu1 }
 0x1c7   : > { %v672_v44 = vadd.f32 %v1283_v42, %v1160_v27  ;;  %1308 = vmatprep.mubr.bf16.mxu0 %v723_v40  ;;  %v711_v50 = vmax.f32 %v661_v43, 0.0 }
 0x1c8   : > { %v663_v46 = vpop.f32.mrf.mxu1  ;;  %1309 = vmatmul.mubr.bf16.vlgmr.msra.gmra.mxu0 %v724_v41 }
 0x1c9   : > { %v664_v47 = vadd.f32 %v1160_v27, %v663_v46  ;;  %v714_v48 = vmax.f32 %v672_v44, 0.0 }
 0x1ca   : > { %v1286_v49 = vpop.f32.mrf.mxu1 }
 0x1cb   : > { %v712_v51 = vmax.f32 %v664_v47, 0.0  ;;  %v726_v55 = vpack.c.bf16 %v714_v48, %v713_v52  ;;  %v685_v59 = vadd.f32 %v1286_v49, %v1160_v27 }
 0x1cc   : > { %v676_v53 = vpop.f32.mrf.mxu1 }
 0x1cd   : > { %v725_v54 = vpack.c.bf16 %v712_v51, %v711_v50  ;;  %v677_v57 = vadd.f32 %v1160_v27, %v676_v53  ;;  %v717_v2 = vmax.f32 %v685_v59, 0.0 }
 0x1ce   : > { %v1287_v56 = vpop.f32.mrf.mxu1 }
 0x1cf   : > { %v688_v58 = vadd.f32 %v1287_v56, %v1160_v27  ;;  %1312 = vmatprep.mubr.bf16.mxu0 %v725_v54  ;;  %v715_v0 = vmax.f32 %v677_v57, 0.0 }
 0x1d0   : > { %v679_v60 = vpop.f32.mrf.mxu1  ;;  %1313 = vmatmul.mubr.bf16.gmra.mxu0 %v726_v55 }
 0x1d1   : > { %v680_v61 = vadd.f32 %v1160_v27, %v679_v60  ;;  %v718_v62 = vmax.f32 %v688_v58, 0.0 }
 0x1d2   : > { %v1290_v63 = vpop.f32.mrf.mxu1 }
 0x1d3   : > { %v716_v1 = vmax.f32 %v680_v61, 0.0  ;;  %v728_v5 = vpack.c.bf16 %v718_v62, %v717_v2  ;;  %v701_v9 = vadd.f32 %v1290_v63, %v1160_v27 }
 0x1d4   : > { %v692_v3 = vpop.f32.mrf.mxu1 }
 0x1d5   : > { %v727_v4 = vpack.c.bf16 %v716_v1, %v715_v0  ;;  %v693_v7 = vadd.f32 %v1160_v27, %v692_v3  ;;  %v721_v15 = vmax.f32 %v701_v9, 0.0 }
 0x1d6   : > { %v1291_v6 = vpop.f32.mrf.mxu1 }
 0x1d7   : > { %v704_v8 = vadd.f32 %v1291_v6, %v1160_v27  ;;  %1316 = vmatprep.mubr.bf16.mxu1 %v727_v4  ;;  %v719_v13 = vmax.f32 %v693_v7, 0.0 }
 0x1d8   : > { %v695_v10 = vpop.f32.mrf.mxu1  ;;  %1317 = vmatmul.mubr.bf16.vlgmr.msra.gmra.mxu1 %v728_v5 }
 0x1d9   : > { %v696_v11 = vadd.f32 %v1160_v27, %v695_v10  ;;  %v722_v12 = vmax.f32 %v704_v8, 0.0 }
 0x1db   : > { %v720_v14 = vmax.f32 %v696_v11, 0.0  ;;  %v730_v17 = vpack.c.bf16 %v722_v12, %v721_v15 }
 0x1dd   : > { %v729_v16 = vpack.c.bf16 %v720_v14, %v719_v13 }
 0x1df   : > { %1320 = vmatprep.mubr.bf16.mxu1 %v729_v16 }
 0x1e0   : > { %1321 = vmatmul.mubr.bf16.gmra.mxu1 %v730_v17 }
 0x288   : > { %v1310_v21 = vpop.f32.mrf.mxu0 }
 0x289   : > { %v845_v22 = vadd.f32 %v1310_v21, %v1169_v20 }
 0x28a   : > { %v836_v23 = vpop.f32.mrf.mxu0 }
 0x28b   : > { %v837_v24 = vadd.f32 %v1169_v20, %v836_v23  ;;  %v1608_v25 = vsel %vm901_vm0, %v845_v22, -1e+30 }
 0x28c   : > { %922 = vmax.xlane.f32.xlu1 %v1608_v25  ;;  %v1311_v26 = vpop.f32.mrf.mxu0 }
 0x28d   : > { %v848_v27 = vadd.f32 %v1311_v26, %v1169_v20  ;;  %v1613_v28 = vsel %vm901_vm0, %v837_v24, -1e+30 }
 0x28e   : > { %v839_v29 = vpop.f32.mrf.mxu0  ;;  %918 = vmax.xlane.f32.xlu0 %v1613_v28 }
 0x28f   : > { %v840_v30 = vadd.f32 %v1169_v20, %v839_v29  ;;  %v905_v31 = vsel %vm901_vm0, %v848_v27, -1e+30 }
 0x290   : > { %924 = vmax.xlane.f32.xlu1 %v905_v31  ;;  %v1314_v32 = vpop.f32.mrf.mxu0 }
 0x291   : > { %v861_v33 = vadd.f32 %v1314_v32, %v1169_v20  ;;  %v903_v34 = vsel %vm901_vm0, %v840_v30, -1e+30 }
 0x292   : > { %v852_v35 = vpop.f32.mrf.mxu0  ;;  %920 = vmax.xlane.f32.xlu0 %v903_v34 }
 0x293   : > { %v853_v37 = vadd.f32 %v1169_v20, %v852_v35  ;;  %v908_v39 = vsel %vm901_vm0, %v861_v33, -1e+30 }
 0x294   : > { %v1315_v36 = vpop.f32.mrf.mxu0 }
 0x295   : > { %v864_v38 = vadd.f32 %v1315_v36, %v1169_v20  ;;  %v906_v45 = vsel %vm901_vm0, %v853_v37, -1e+30 }
 0x296   : > { %v855_v40 = vpop.f32.mrf.mxu0  ;;  %930 = vmax.xlane.f32.xlu0 %v908_v39 }
 0x297   : > { %v856_v41 = vadd.f32 %v1169_v20, %v855_v40  ;;  %v909_v42 = vsel %vm901_vm0, %v864_v38, -1e+30 }
 0x298   : > { %v1318_v43 = vpop.f32.mrf.mxu1  ;;  %932 = vmax.xlane.f32.xlu1 %v909_v42 }
 0x299   : > { %v877_v44 = vadd.f32 %v1318_v43, %v1169_v20  ;;  %v1628_v47 = vsel %vm901_vm0, %v856_v41, -1e+30 }
 0x29a   : > { %v868_v46 = vpop.f32.mrf.mxu1  ;;  %926 = vmax.xlane.f32.xlu0 %v906_v45 }
 0x29b   : > { %v869_v49 = vadd.f32 %v1169_v20, %v868_v46  ;;  %v1633_v51 = vsel %vm901_vm0, %v877_v44, -1e+30 }
 0x29c   : > { %v1319_v48 = vpop.f32.mrf.mxu1  ;;  %928 = vmax.xlane.f32.xlu1 %v1628_v47 }
 0x29d   : > { %v880_v50 = vadd.f32 %v1319_v48, %v1169_v20  ;;  %v1643_v56 = vsel %vm901_vm0, %v869_v49, -1e+30 }
 0x29e   : > { %v871_v52 = vpop.f32.mrf.mxu1  ;;  %938 = vmax.xlane.f32.xlu0 %v1633_v51 }
 0x29f   : > { %v872_v53 = vadd.f32 %v1169_v20, %v871_v52  ;;  %v1638_v54 = vsel %vm901_vm0, %v880_v50, -1e+30 }
 0x2a0   : > { %v1322_v55 = vpop.f32.mrf.mxu1  ;;  %940 = vmax.xlane.f32.xlu1 %v1638_v54 }
 0x2a1   : > { %v1648_v59 = vsel %vm901_vm0, %v872_v53, -1e+30  ;;  %v893_v61 = vadd.f32 %v1322_v55, %v1169_v20 }
 0x2a2   : > { %v884_v57 = vpop.f32.mrf.mxu1  ;;  %934 = vmax.xlane.f32.xlu0 %v1643_v56 }
 0x2a3   : > { %v885_v58 = vadd.f32 %v1169_v20, %v884_v57  ;;  %v1662_v3 = vsel %vm901_vm0, %v893_v61, -1e+30 }
 0x2a4   : > { %v1323_v60 = vpop.f32.mrf.mxu1  ;;  %936 = vmax.xlane.f32.xlu1 %v1648_v59 }
 0x2a5   : > { %v1653_v62 = vsel %vm901_vm0, %v885_v58, -1e+30  ;;  %v896_v1 = vadd.f32 %v1323_v60, %v1169_v20 }
 0x2a6   : > { %v887_v63 = vpop.f32.mrf.mxu1  ;;  %942 = vmax.xlane.f32.xlu0 %v1653_v62 }
 0x2a7   : > { %v888_v0 = vadd.f32 %v1169_v20, %v887_v63  ;;  %v1668_v4 = vsel %vm901_vm0, %v896_v1, -1e+30 }
 0x2a9   : > { %v1658_v2 = vsel %vm901_vm0, %v888_v0, -1e+30 }
 0x2aa   : > { %944 = vmax.xlane.f32.xlu1 %v1658_v2  ;;  %946 = vmax.xlane.f32.xlu0 %v1662_v3 }
 0x2ae   : > { %948 = vmax.xlane.f32.xlu1 %v1668_v4 }
 0x315   : > { %v923_v5 = vpop.xlane.xlu1 %922 }
 0x316   : > { %v952_v6 = vsub.f32 %v1608_v25, %v923_v5 }
 0x317   : > { %v919_v7 = vpop.xlane.xlu0 %918 }
 0x318   : > { %v970_v8 = vmul.f32 1.442695, %v952_v6  ;;  %v950_v9 = vsub.f32 %v1613_v28, %v919_v7 }
 0x319   : > { %v925_v10 = vpop.xlane.xlu1 %924 }
 0x31a   : > { %1380 = vpow2.f32 %v970_v8  ;;  %v966_v11 = vmul.f32 1.442695, %v950_v9  ;;  %v953_v12 = vsub.f32 %v905_v31, %v925_v10 }
 0x31b   : > { %v921_v13 = vpop.xlane.xlu0 %920 }
 0x31c   : > { %v972_v14 = vmul.f32 1.442695, %v953_v12  ;;  %v951_v15 = vsub.f32 %v903_v34, %v921_v13  ;;  %1382 = vpow2.f32 %v966_v11 }
 0x31e   : > { %1384 = vpow2.f32 %v972_v14  ;;  %v968_v16 = vmul.f32 1.442695, %v951_v15 }
 0x31f   : > { %v931_v17 = vpop.xlane.xlu0 %930 }
 0x320   : > { %v956_v18 = vsub.f32 %v908_v39, %v931_v17  ;;  %1386 = vpow2.f32 %v968_v16 }
 0x321   : > { %v933_v19 = vpop.xlane.xlu1 %932 }
 0x322   : > { %v978_v20 = vmul.f32 1.442695, %v956_v18  ;;  %v957_v21 = vsub.f32 %v909_v42, %v933_v19 }
 0x323   : > { %v927_v22 = vpop.xlane.xlu0 %926 }
 0x324   : > { %1388 = vpow2.f32 %v978_v20  ;;  %v980_v23 = vmul.f32 1.442695, %v957_v21  ;;  %v954_v24 = vsub.f32 %v906_v45, %v927_v22 }
 0x325   : > { %v929_v25 = vpop.xlane.xlu1 %928 }
 0x326   : > { %1390 = vpow2.f32 %v980_v23  ;;  %v974_v26 = vmul.f32 1.442695, %v954_v24  ;;  %v955_v27 = vsub.f32 %v1628_v47, %v929_v25 }
 0x327   : > { %v1674_v28 = vpop.eup %1380  ;;  %v939_v29 = vpop.xlane.xlu0 %938 }
 0x328   : > { %1392 = vpow2.f32 %v974_v26  ;;  %v976_v30 = vmul.f32 1.442695, %v955_v27  ;;  %v960_v31 = vsub.f32 %v1633_v51, %v939_v29  ;;  %1002 = vadd.xlane.f32.xlu0 %v1674_v28 }
 0x329   : > { %v941_v32 = vpop.xlane.xlu1 %940  ;;  %v1678_v33 = vpop.eup %1382 }
 0x32a   : > { %1394 = vpow2.f32 %v976_v30  ;;  %v986_v34 = vmul.f32 1.442695, %v960_v31  ;;  %v961_v35 = vsub.f32 %v1638_v54, %v941_v32 }
 0x32b   : > { %v1681_v36 = vpop.eup %1384  ;;  %v935_v37 = vpop.xlane.xlu0 %934 }
 0x32c   : > { %1396 = vpow2.f32 %v986_v34  ;;  %v988_v38 = vmul.f32 1.442695, %v961_v35  ;;  %v958_v39 = vsub.f32 %v1643_v56, %v935_v37  ;;  %1004 = vadd.xlane.f32.xlu1 %v1681_v36  ;;  %998 = vadd.xlane.f32.xlu0 %v1678_v33 }
 0x32d   : > { %v937_v40 = vpop.xlane.xlu1 %936  ;;  %v1687_v43 = vpop.eup %1386 }
 0x32e   : > { %1398 = vpow2.f32 %v988_v38  ;;  %v982_v41 = vmul.f32 1.442695, %v958_v39  ;;  %v959_v42 = vsub.f32 %v1648_v59, %v937_v40 }
 0x32f   : > { %v943_v44 = vpop.xlane.xlu0 %942 }
 0x330   : > { %1400 = vpow2.f32 %v982_v41  ;;  %v984_v45 = vmul.f32 1.442695, %v959_v42  ;;  %v962_v46 = vsub.f32 %v1653_v62, %v943_v44  ;;  %1000 = vadd.xlane.f32.xlu1 %v1687_v43 }
 0x331   : > { %v1691_v47 = vpop.eup %1388 }
 0x332   : > { %1402 = vpow2.f32 %v984_v45  ;;  %v990_v48 = vmul.f32 1.442695, %v962_v46  ;;  %1010 = vadd.xlane.f32.xlu0 %v1691_v47 }
 0x333   : > { %v1694_v49 = vpop.eup %1390  ;;  %v945_v50 = vpop.xlane.xlu1 %944 }
 0x334   : > { %v947_v51 = vpop.xlane.xlu0 %946  ;;  %1404 = vpow2.f32 %v990_v48  ;;  %v963_v52 = vsub.f32 %v1658_v2, %v945_v50  ;;  %1012 = vadd.xlane.f32.xlu1 %v1694_v49 }
 0x335   : > { %v964_v53 = vsub.f32 %v1662_v3, %v947_v51  ;;  %v1699_v54 = vpop.eup %1392 }
 0x336   : > { %v992_v55 = vmul.f32 1.442695, %v963_v52  ;;  %1006 = vadd.xlane.f32.xlu0 %v1699_v54 }
 0x337   : > { %v994_v56 = vmul.f32 1.442695, %v964_v53  ;;  %v1702_v57 = vpop.eup %1394  ;;  %v949_v58 = vpop.xlane.xlu1 %948 }
 0x338   : > { %1406 = vpow2.f32 %v992_v55  ;;  %v965_v59 = vsub.f32 %v1668_v4, %v949_v58  ;;  %1008 = vadd.xlane.f32.xlu1 %v1702_v57 }
 0x339   : > { %v1706_v60 = vpop.eup %1396  ;;  %1408 = vpow2.f32 %v994_v56 }
 0x33a   : > { %v996_v61 = vmul.f32 1.442695, %v965_v59  ;;  %1018 = vadd.xlane.f32.xlu0 %v1706_v60 }
 0x33b   : > { %v1709_v62 = vpop.eup %1398 }
 0x33c   : > { %1410 = vpow2.f32 %v996_v61  ;;  %1020 = vadd.xlane.f32.xlu1 %v1709_v62 }
 0x33d   : > { %v1712_v63 = vpop.eup %1400 }
 0x33e   : > { %1014 = vadd.xlane.f32.xlu0 %v1712_v63 }
 0x33f   : > { %v1715_v0 = vpop.eup %1402 }
 0x340   : > { %1016 = vadd.xlane.f32.xlu1 %v1715_v0 }
 0x341   : > { %v1718_v1 = vpop.eup %1404 }
 0x342   : > { %1022 = vadd.xlane.f32.xlu0 %v1718_v1 }
 0x345   : > { %v1721_v2 = vpop.eup %1406 }
 0x346   : > { %v1723_v3 = vpop.eup %1408  ;;  %1024 = vadd.xlane.f32.xlu1 %v1721_v2 }
 0x347   : > { %1026 = vadd.xlane.f32.xlu0 %v1723_v3 }
 0x349   : > { %v1727_v4 = vpop.eup %1410 }
 0x34a   : > { %1028 = vadd.xlane.f32.xlu1 %v1727_v4 }
 0x3b1   : > { %v1003_v5 = vpop.xlane.xlu0 %1002 }
 0x3b2   : > { %1412 = vrcp.f32 %v1003_v5 }
 0x3b5   : > { %v1005_v6 = vpop.xlane.xlu1 %1004  ;;  %v999_v7 = vpop.xlane.xlu0 %998 }
 0x3b6   : > { %1414 = vrcp.f32 %v1005_v6 }
 0x3b7   : > { %1416 = vrcp.f32 %v999_v7 }
 0x3b9   : > { %v1001_v8 = vpop.xlane.xlu1 %1000 }
 0x3ba   : > { %1418 = vrcp.f32 %v1001_v8 }
 0x3bb   : > { %v1011_v9 = vpop.xlane.xlu0 %1010 }
 0x3bc   : > { %1420 = vrcp.f32 %v1011_v9 }
 0x3bd   : > { %v1013_v10 = vpop.xlane.xlu1 %1012 }
 0x3be   : > { %1422 = vrcp.f32 %v1013_v10 }
 0x3bf   : > { %v1413_v11 = vpop.eup %1412  ;;  %v1007_v12 = vpop.xlane.xlu0 %1006 }
 0x3c0   : > { %v1048_v13 = vmul.f32 %v1413_v11, %v1674_v28  ;;  %1424 = vrcp.f32 %v1007_v12 }
 0x3c1   : > { %v1009_v14 = vpop.xlane.xlu1 %1008 }
 0x3c2   : > { %1064 = vst [vmem:[%s1734_s23 + $0x10] sm:$0xff] %v1048_v13  ;;  %1426 = vrcp.f32 %v1009_v14 }
 0x3c3   : > { %v1415_v15 = vpop.eup %1414  ;;  %v1019_v16 = vpop.xlane.xlu0 %1018 }
 0x3c4   : > { %v1417_v17 = vpop.eup %1416  ;;  %v1049_v18 = vmul.f32 %v1415_v15, %v1681_v36  ;;  %1428 = vrcp.f32 %v1019_v16 }
 0x3c5   : > { %v1046_v19 = vmul.f32 %v1417_v17, %v1678_v33  ;;  %v1021_v20 = vpop.xlane.xlu1 %1020 }
 0x3c6   : > { %1065 = vst [vmem:[%s1734_s23 + $0x18] sm:$0xff] %v1049_v18  ;;  %1430 = vrcp.f32 %v1021_v20 }
 0x3c7   : > { %v1419_v21 = vpop.eup %1418  ;;  %1062 = vst [vmem:[%s1734_s23] sm:$0xff] %v1046_v19  ;;  %v1015_v22 = vpop.xlane.xlu0 %1014 }
 0x3c8   : > { %v1047_v23 = vmul.f32 %v1419_v21, %v1687_v43  ;;  %1432 = vrcp.f32 %v1015_v22 }
 0x3c9   : > { %v1421_v24 = vpop.eup %1420  ;;  %v1017_v25 = vpop.xlane.xlu1 %1016 }
 0x3ca   : > { %1063 = vst [vmem:[%s1734_s23 + $0x8] sm:$0xff] %v1047_v23  ;;  %v1052_v26 = vmul.f32 %v1421_v24, %v1691_v47  ;;  %1434 = vrcp.f32 %v1017_v25 }
 0x3cb   : > { %v1423_v27 = vpop.eup %1422  ;;  %v1023_v28 = vpop.xlane.xlu0 %1022 }
 0x3cc   : > { %1068 = vst [vmem:[%s1734_s23 + $0x30] sm:$0xff] %v1052_v26  ;;  %v1053_v29 = vmul.f32 %v1423_v27, %v1694_v49  ;;  %1436 = vrcp.f32 %v1023_v28 }
 0x3cd   : > { %v1425_v30 = vpop.eup %1424 }
 0x3ce   : > { %1069 = vst [vmem:[%s1734_s23 + $0x38] sm:$0xff] %v1053_v29  ;;  %v1050_v31 = vmul.f32 %v1425_v30, %v1699_v54 }
 0x3cf   : > { %v1427_v32 = vpop.eup %1426  ;;  %v1025_v33 = vpop.xlane.xlu1 %1024 }
 0x3d0   : > { %1066 = vst [vmem:[%s1734_s23 + $0x20] sm:$0xff] %v1050_v31  ;;  %v1051_v34 = vmul.f32 %v1427_v32, %v1702_v57  ;;  %1438 = vrcp.f32 %v1025_v33  ;;  %v1027_v35 = vpop.xlane.xlu0 %1026 }
 0x3d1   : > { %v1429_v36 = vpop.eup %1428  ;;  %1440 = vrcp.f32 %v1027_v35 }
 0x3d2   : > { %1067 = vst [vmem:[%s1734_s23 + $0x28] sm:$0xff] %v1051_v34  ;;  %v1056_v37 = vmul.f32 %v1429_v36, %v1706_v60 }
 0x3d3   : > { %v1431_v38 = vpop.eup %1430  ;;  %v1029_v39 = vpop.xlane.xlu1 %1028 }
 0x3d4   : > { %1072 = vst [vmem:[%s1734_s23 + $0x50] sm:$0xff] %v1056_v37  ;;  %v1057_v40 = vmul.f32 %v1431_v38, %v1709_v62  ;;  %1442 = vrcp.f32 %v1029_v39 }
 0x3d5   : > { %v1433_v41 = vpop.eup %1432 }
 0x3d6   : > { %1073 = vst [vmem:[%s1734_s23 + $0x58] sm:$0xff] %v1057_v40  ;;  %v1054_v42 = vmul.f32 %v1433_v41, %v1712_v63 }
 0x3d7   : > { %v1435_v43 = vpop.eup %1434 }
 0x3d8   : > { %1070 = vst [vmem:[%s1734_s23 + $0x40] sm:$0xff] %v1054_v42  ;;  %v1055_v44 = vmul.f32 %v1435_v43, %v1715_v0 }
 0x3d9   : > { %v1437_v45 = vpop.eup %1436 }
 0x3da   : > { %1071 = vst [vmem:[%s1734_s23 + $0x48] sm:$0xff] %v1055_v44  ;;  %v1058_v46 = vmul.f32 %v1437_v45, %v1718_v1 }
 0x3dc   : > { %1074 = vst [vmem:[%s1734_s23 + $0x60] sm:$0xff] %v1058_v46 }
 0x3dd   : > { %v1439_v47 = vpop.eup %1438 }
 0x3de   : > { %v1441_v48 = vpop.eup %1440  ;;  %v1059_v49 = vmul.f32 %v1439_v47, %v1721_v2 }
 0x3df   : > { %v1060_v50 = vmul.f32 %v1441_v48, %v1723_v3 }
 0x3e0   : > { %1075 = vst [vmem:[%s1734_s23 + $0x68] sm:$0xff] %v1059_v49 }
 0x3e1   : > { %v1443_v51 = vpop.eup %1442  ;;  %1076 = vst [vmem:[%s1734_s23 + $0x70] sm:$0xff] %v1060_v50 }
 0x3e2   : > { %v1061_v52 = vmul.f32 %v1443_v51, %v1727_v4 }
 0x3e4   : > { %1077 = vst [vmem:[%s1734_s23 + $0x78] sm:$0xff] %v1061_v52 }
 0x3e5 PF: > { %s17_s24 = sadd.s32 1, %s1450_s24  }
 0x3e6   : > { %p14_p4 = scmp.ge.s32.totalorder %s17_s24, 4  }
 0x3e8   :  { %16 = sbr.rel (!%p14_p4) target bundleno = 1 (0x1), region = 78 }

</bundles_post_ra>
